<compile_context>
chip_gen: v5e
topology: v5e:2x2
jax: 0.10.0
libtpu: 0.0.40
codegen_flags: <defaults>
</compile_context>

<pallas_src>
import jax
import jax.numpy as jnp
from jax import lax
from jax.experimental import pallas as pl
from jax.experimental.pallas import tpu as pltpu


# ----------------------------- kernel ---------------------------------------


def conv1d_block_kernel(x_ref, w_ref, c_ref, out_ref):
    """One batch element per grid step; NCT layout kept throughout.

    x_ref:   [Cin, T]        input features (batch dim squeezed), native dtype
    w_ref:   [K, Cout, Cin]  conv weight, tap-major, in matmul dtype
    c_ref:   [3, Cout, 1]    packed constants: [conv bias, BN scale, BN shift]
    out_ref: [Cout, Tp]      Tp = round_up(T + K//2, 128)  (lane-dense stores;
                             columns [T, Tp) are padding, sliced off outside)
    """
    Cin, T = x_ref.shape
    K, Cout, _ = w_ref.shape
    Tp = out_ref.shape[-1]
    pad = K // 2
    mm_dtype = w_ref.dtype

    x = x_ref[...]                                           # [Cin, T] native dtype
    if Tp > T:
        # zero tail gives the left/right "same" halo for free under roll
        x = jnp.concatenate(
            [x, jnp.zeros((Cin, Tp - T), x.dtype)], axis=1)  # [Cin, Tp]

    # Conv as K accumulating MXU dots on XLU-rotated views (no im2col copy).
    acc = None
    for k in range(K):
        shift = (pad - k) % Tp                               # static python int
        xk = pltpu.roll(x, shift=shift, axis=1) if shift else x
        d = jnp.dot(w_ref[k], xk.astype(mm_dtype),
                    preferred_element_type=jnp.float32)      # [Cout, Tp] f32
        acc = d if acc is None else acc + d

    bias = c_ref[0]                                          # [Cout, 1] f32
    scale = c_ref[1]                                         # gamma / sqrt(var+eps)
    shift_c = c_ref[2]                                       # beta - mean * scale
    y = jnp.maximum(acc + bias, 0.0)                         # conv bias + ReLU
    out_ref[...] = (y * scale + shift_c).astype(out_ref.dtype)   # folded BN
    # dropout: identity in eval mode


# ----------------------------- wrapper ---------------------------------------


def _round_up(n, m):
    return ((n + m - 1) // m) * m


def conv1d_block_forward(x, conv_w, conv_b, bn_gamma, bn_beta, bn_mean, bn_var,
                         *, eps=1e-5, matmul_dtype=jnp.bfloat16, out_dtype=None):
    """Conv1DBlock.forward (eval mode): x [B, Cin, T] -> [B, Cout, T].

    matmul_dtype=bf16 (default) feeds bf16 operands to the MXU with f32
    accumulation; pass jnp.float32 for PyTorch-matching numerics.
    """
    B, Cin, T = x.shape
    Cout, Cin_w, K = conv_w.shape
    assert Cin_w == Cin
    assert K % 2 == 1, "Only odd filter sizes allowed"      # matches the module
    pad = K // 2
    out_dtype = x.dtype if out_dtype is None else out_dtype

    # Output time axis padded so (a) stores are lane-dense (multiple of 128)
    # and (b) there is >= pad slack so roll-wrapped halo columns land on zeros.
    Tp = _round_up(T + pad, 128)

    # [Cout, Cin, K] -> [K, Cout, Cin] so each tap is a contiguous MXU operand.
    w_koc = jnp.transpose(conv_w, (2, 0, 1)).astype(matmul_dtype)
    scale = (bn_gamma.astype(jnp.float32) /
             jnp.sqrt(bn_var.astype(jnp.float32) + eps))
    shift = bn_beta.astype(jnp.float32) - bn_mean.astype(jnp.float32) * scale
    consts = jnp.stack(
        [conv_b.astype(jnp.float32), scale, shift]).reshape(3, Cout, 1)

    grid_spec = pltpu.PrefetchScalarGridSpec(
        num_scalar_prefetch=0,
        grid=(B,),
        in_specs=[
            pl.BlockSpec((None, Cin, T), lambda b: (b, 0, 0)),     # activation
            pl.BlockSpec((K, Cout, Cin), lambda b: (0, 0, 0)),     # weights (resident)
            pl.BlockSpec((3, Cout, 1), lambda b: (0, 0, 0)),       # packed constants
        ],
        out_specs=pl.BlockSpec((None, Cout, Tp), lambda b: (b, 0, 0)),
    )
    out = pl.pallas_call(
        conv1d_block_kernel,
        out_shape=jax.ShapeDtypeStruct((B, Cout, Tp), out_dtype),
        grid_spec=grid_spec,
        compiler_params=pltpu.CompilerParams(
            dimension_semantics=("parallel",),       # batch steps independent
            vmem_limit_bytes=64 * 1024 * 1024),      # allow large whole-T blocks
    )(x, w_koc, consts)
    return out[..., :T] if Tp != T else out


# ----------------------------- reference -------------------------------------


def conv1d_block_reference(x, conv_w, conv_b, bn_gamma, bn_beta, bn_mean, bn_var,
                           eps=1e-5):
    """Pure-JAX reference of the eval-mode Conv1DBlock forward."""
    K = conv_w.shape[-1]
    y = lax.conv_general_dilated(
        x, conv_w, window_strides=(1,), padding=[(K // 2, K // 2)],
        dimension_numbers=("NCH", "OIH", "NCH"),
        precision=lax.Precision.HIGHEST)
    y = y + conv_b[None, :, None]
    y = jnp.maximum(y, 0.0)
    inv = bn_gamma / jnp.sqrt(bn_var + eps)
    return inv[None, :, None] * (y - bn_mean[None, :, None]) + bn_beta[None, :, None]


# ----------------------------- main -------------------------------------------


if __name__ == "__main__":
    B, Cin, Cout, T, K = 2, 48, 32, 16, 5      # small shapes consistent with the module
    key = jax.random.PRNGKey(0)
    kx, kw, kb, kg, kbe, km, kv = jax.random.split(key, 7)

    x = jax.random.normal(kx, (B, Cin, T), dtype=jnp.float32)
    conv_w = 0.1 * jax.random.normal(kw, (Cout, Cin, K), dtype=jnp.float32)
    conv_b = 0.1 * jax.random.normal(kb, (Cout,), dtype=jnp.float32)
    bn_gamma = 1.0 + 0.1 * jax.random.normal(kg, (Cout,), dtype=jnp.float32)
    bn_beta = 0.1 * jax.random.normal(kbe, (Cout,), dtype=jnp.float32)
    bn_mean = 0.1 * jax.random.normal(km, (Cout,), dtype=jnp.float32)
    bn_var = 0.5 + jnp.abs(0.1 * jax.random.normal(kv, (Cout,), dtype=jnp.float32))

    ref = conv1d_block_reference(x, conv_w, conv_b, bn_gamma, bn_beta,
                                 bn_mean, bn_var)

    # f32-operand path: tight tolerance against the PyTorch-equivalent reference.
    out_f32 = conv1d_block_forward(x, conv_w, conv_b, bn_gamma, bn_beta,
                                   bn_mean, bn_var, matmul_dtype=jnp.float32)
    out_f32 = jax.block_until_ready(out_f32)
    assert out_f32.shape == (B, Cout, T)
    assert bool(jnp.all(jnp.isfinite(out_f32)))
    assert bool(jnp.max(jnp.abs(out_f32 - ref)) < 2e-3)

    # default bf16-operand path (f32 accumulate): looser tolerance.
    out_bf16 = conv1d_block_forward(x, conv_w, conv_b, bn_gamma, bn_beta,
                                    bn_mean, bn_var)
    out_bf16 = jax.block_until_ready(out_bf16)
    assert out_bf16.shape == (B, Cout, T)
    assert bool(jnp.all(jnp.isfinite(out_bf16)))
    assert bool(jnp.max(jnp.abs(out_bf16 - ref)) < 1e-1)

    print("KERNEL_OK")
</pallas_src>

<mosaic_0001>
module attributes {stable_mosaic.version = 11 : i64} {
  func.func @conv1d_block_kernel(%arg0: i32, %arg1: memref<1x48x16xf32, #tpu.memory_space<vmem>>, %arg2: memref<5x32x48xf32, #tpu.memory_space<vmem>>, %arg3: memref<3x32x1xf32, #tpu.memory_space<vmem>>, %arg4: memref<1x32x128xf32, #tpu.memory_space<vmem>>) attributes {dimension_semantics = [#tpu.dimension_semantics<parallel>], iteration_bounds = array<i64: 2>, scalar_prefetch = 0 : i64, scratch_operands = 0 : i64, tpu.core_type = #tpu.core_type<tc>, window_params = [{transform_indices = @transform_0, window_bounds = array<i64: 1, 48, 16>}, {pipeline_mode = #tpu.pipeline_mode<synchronous>, transform_indices = @transform_1, window_bounds = array<i64: 5, 32, 48>}, {pipeline_mode = #tpu.pipeline_mode<synchronous>, transform_indices = @transform_2, window_bounds = array<i64: 3, 32, 1>}, {transform_indices = @transform_3, window_bounds = array<i64: 1, 32, 128>}]} {
    %c0 = arith.constant 0 : index
    %c0_0 = arith.constant 0 : index
    %c0_1 = arith.constant 0 : index
    %0 = vector.load %arg1[%c0, %c0_0, %c0_1] : memref<1x48x16xf32, #tpu.memory_space<vmem>>, vector<1x48x16xf32>
    %1 = vector.shape_cast %0 : vector<1x48x16xf32> to vector<48x16xf32>
    %cst = arith.constant 0.000000e+00 : f32
    %2 = vector.broadcast %cst : f32 to vector<48x112xf32>
    %3 = tpu.concatenate %1, %2 in 1 : vector<48x16xf32>, vector<48x112xf32> -> vector<48x128xf32>
    %c2_i32 = arith.constant 2 : i32
    %4 = tpu.dynamic_rotate %3 by %c2_i32 dim 1 : vector<48x128xf32>, i32 -> vector<48x128xf32>
    %c0_2 = arith.constant 0 : index
    %c0_3 = arith.constant 0 : index
    %c0_4 = arith.constant 0 : index
    %5 = vector.load %arg2[%c0_2, %c0_3, %c0_4] : memref<5x32x48xf32, #tpu.memory_space<vmem>>, vector<1x32x48xf32>
    %6 = vector.shape_cast %5 : vector<1x32x48xf32> to vector<32x48xf32>
    %cst_5 = arith.constant dense<0.000000e+00> : vector<32x128xf32>
    %7 = tpu.matmul %6, %4, %cst_5 {dimension_numbers = #tpu.dot_dimension_numbers<[1], [0], [0], [1], [0, 0, 1, 1], [], []>} : vector<32x48xf32>, vector<48x128xf32>, vector<32x128xf32> -> vector<32x128xf32>
    %c1_i32 = arith.constant 1 : i32
    %8 = tpu.dynamic_rotate %3 by %c1_i32 dim 1 : vector<48x128xf32>, i32 -> vector<48x128xf32>
    %c1 = arith.constant 1 : index
    %c0_6 = arith.constant 0 : index
    %c0_7 = arith.constant 0 : index
    %9 = vector.load %arg2[%c1, %c0_6, %c0_7] : memref<5x32x48xf32, #tpu.memory_space<vmem>>, vector<1x32x48xf32>
    %10 = vector.shape_cast %9 : vector<1x32x48xf32> to vector<32x48xf32>
    %cst_8 = arith.constant dense<0.000000e+00> : vector<32x128xf32>
    %11 = tpu.matmul %10, %8, %cst_8 {dimension_numbers = #tpu.dot_dimension_numbers<[1], [0], [0], [1], [0, 0, 1, 1], [], []>} : vector<32x48xf32>, vector<48x128xf32>, vector<32x128xf32> -> vector<32x128xf32>
    %12 = arith.addf %7, %11 : vector<32x128xf32>
    %c2 = arith.constant 2 : index
    %c0_9 = arith.constant 0 : index
    %c0_10 = arith.constant 0 : index
    %13 = vector.load %arg2[%c2, %c0_9, %c0_10] : memref<5x32x48xf32, #tpu.memory_space<vmem>>, vector<1x32x48xf32>
    %14 = vector.shape_cast %13 : vector<1x32x48xf32> to vector<32x48xf32>
    %cst_11 = arith.constant dense<0.000000e+00> : vector<32x128xf32>
    %15 = tpu.matmul %14, %3, %cst_11 {dimension_numbers = #tpu.dot_dimension_numbers<[1], [0], [0], [1], [0, 0, 1, 1], [], []>} : vector<32x48xf32>, vector<48x128xf32>, vector<32x128xf32> -> vector<32x128xf32>
    %16 = arith.addf %12, %15 : vector<32x128xf32>
    %c127_i32 = arith.constant 127 : i32
    %17 = tpu.dynamic_rotate %3 by %c127_i32 dim 1 : vector<48x128xf32>, i32 -> vector<48x128xf32>
    %c3 = arith.constant 3 : index
    %c0_12 = arith.constant 0 : index
    %c0_13 = arith.constant 0 : index
    %18 = vector.load %arg2[%c3, %c0_12, %c0_13] : memref<5x32x48xf32, #tpu.memory_space<vmem>>, vector<1x32x48xf32>
    %19 = vector.shape_cast %18 : vector<1x32x48xf32> to vector<32x48xf32>
    %cst_14 = arith.constant dense<0.000000e+00> : vector<32x128xf32>
    %20 = tpu.matmul %19, %17, %cst_14 {dimension_numbers = #tpu.dot_dimension_numbers<[1], [0], [0], [1], [0, 0, 1, 1], [], []>} : vector<32x48xf32>, vector<48x128xf32>, vector<32x128xf32> -> vector<32x128xf32>
    %21 = arith.addf %16, %20 : vector<32x128xf32>
    %c126_i32 = arith.constant 126 : i32
    %22 = tpu.dynamic_rotate %3 by %c126_i32 dim 1 : vector<48x128xf32>, i32 -> vector<48x128xf32>
    %c4 = arith.constant 4 : index
    %c0_15 = arith.constant 0 : index
    %c0_16 = arith.constant 0 : index
    %23 = vector.load %arg2[%c4, %c0_15, %c0_16] : memref<5x32x48xf32, #tpu.memory_space<vmem>>, vector<1x32x48xf32>
    %24 = vector.shape_cast %23 : vector<1x32x48xf32> to vector<32x48xf32>
    %cst_17 = arith.constant dense<0.000000e+00> : vector<32x128xf32>
    %25 = tpu.matmul %24, %22, %cst_17 {dimension_numbers = #tpu.dot_dimension_numbers<[1], [0], [0], [1], [0, 0, 1, 1], [], []>} : vector<32x48xf32>, vector<48x128xf32>, vector<32x128xf32> -> vector<32x128xf32>
    %26 = arith.addf %21, %25 : vector<32x128xf32>
    %c0_18 = arith.constant 0 : index
    %c0_19 = arith.constant 0 : index
    %c0_20 = arith.constant 0 : index
    %27 = vector.load %arg3[%c0_18, %c0_19, %c0_20] : memref<3x32x1xf32, #tpu.memory_space<vmem>>, vector<1x32x1xf32>
    %28 = vector.shape_cast %27 : vector<1x32x1xf32> to vector<32x1xf32>
    %c1_21 = arith.constant 1 : index
    %c0_22 = arith.constant 0 : index
    %c0_23 = arith.constant 0 : index
    %29 = vector.load %arg3[%c1_21, %c0_22, %c0_23] : memref<3x32x1xf32, #tpu.memory_space<vmem>>, vector<1x32x1xf32>
    %30 = vector.shape_cast %29 : vector<1x32x1xf32> to vector<32x1xf32>
    %c2_24 = arith.constant 2 : index
    %c0_25 = arith.constant 0 : index
    %c0_26 = arith.constant 0 : index
    %31 = vector.load %arg3[%c2_24, %c0_25, %c0_26] : memref<3x32x1xf32, #tpu.memory_space<vmem>>, vector<1x32x1xf32>
    %32 = vector.shape_cast %31 : vector<1x32x1xf32> to vector<32x1xf32>
    %33 = vector.broadcast %28 : vector<32x1xf32> to vector<32x128xf32>
    %34 = arith.addf %26, %33 : vector<32x128xf32>
    %cst_27 = arith.constant 0.000000e+00 : f32
    %35 = vector.broadcast %cst_27 : f32 to vector<32x128xf32>
    %36 = arith.maximumf %34, %35 : vector<32x128xf32>
    %37 = vector.broadcast %30 : vector<32x1xf32> to vector<32x128xf32>
    %38 = arith.mulf %36, %37 : vector<32x128xf32>
    %39 = vector.broadcast %32 : vector<32x1xf32> to vector<32x128xf32>
    %40 = arith.addf %38, %39 : vector<32x128xf32>
    %c0_28 = arith.constant 0 : index
    %c0_29 = arith.constant 0 : index
    %c0_30 = arith.constant 0 : index
    %41 = vector.load %arg4[%c0_28, %c0_29, %c0_30] : memref<1x32x128xf32, #tpu.memory_space<vmem>>, vector<1x32x128xf32>
    %42 = vector.shape_cast %41 : vector<1x32x128xf32> to vector<32x128xf32>
    %43 = vector.shape_cast %40 : vector<32x128xf32> to vector<1x32x128xf32>
    tpu.vector_store %arg4[%c0_28, %c0_29, %c0_30], %43 {strides = array<i32>} : memref<1x32x128xf32, #tpu.memory_space<vmem>>, vector<1x32x128xf32>,
    return
  }
  func.func @transform_0(%arg0: i32) -> (i32, i32, i32) {
    %c0_i32 = arith.constant 0 : i32
    %c0_i32_0 = arith.constant 0 : i32
    %c0_i32_1 = arith.constant 0 : i32
    return %arg0, %c0_i32, %c0_i32_0 : i32, i32, i32
  }
  func.func @transform_1(%arg0: i32) -> (i32, i32, i32) {
    %c0_i32 = arith.constant 0 : i32
    %c0_i32_0 = arith.constant 0 : i32
    %c0_i32_1 = arith.constant 0 : i32
    %c0_i32_2 = arith.constant 0 : i32
    return %c0_i32, %c0_i32_0, %c0_i32_1 : i32, i32, i32
  }
  func.func @transform_2(%arg0: i32) -> (i32, i32, i32) {
    %c0_i32 = arith.constant 0 : i32
    %c0_i32_0 = arith.constant 0 : i32
    %c0_i32_1 = arith.constant 0 : i32
    %c0_i32_2 = arith.constant 0 : i32
    return %c0_i32, %c0_i32_0, %c0_i32_1 : i32, i32, i32
  }
  func.func @transform_3(%arg0: i32) -> (i32, i32, i32) {
    %c0_i32 = arith.constant 0 : i32
    %c0_i32_0 = arith.constant 0 : i32
    %c0_i32_1 = arith.constant 0 : i32
    return %arg0, %c0_i32, %c0_i32_0 : i32, i32, i32
  }
}

</mosaic_0001>

<bundles_post_ra>
// kernel: tpu_custom_call.1
= control target key start
LH: loop header
LB: loop body
LE: loop exit
PB: predicated region body
PF: predicated region fallthrough
CT: control target
= control target key end

     0   :  { %8 = vsyncpa [#allocation3], 0  ;;  %s1147_s0 = inlined_call_operand.vmem [shape: f32[2,48,16], index: 0, kind: input, shape index: {}]   ;;  %s1148_s1 = inlined_call_operand.vmem [shape: f32[5,32,48], index: 1, kind: input, shape index: {}]   ;;  %s1149_s2 = inlined_call_operand.vmem [shape: f32[3,32,1], index: 2, kind: input, shape index: {}]   ;;  %s1150_s3 = inlined_call_operand.hbm [shape: f32[2,32,128], index: 3, kind: output, shape index: {}]  }
   0x1   :  { %10 = vsyncpa [#allocation3 + $0x1], 0  ;;  %s919_s12 = smov 0   ;;  %s921_s13 = smov 0  }
   0x2   :  { %s923_s14 = smov 0   ;;  %s925_s15 = smov 0  }
   0x3 LB: > { %s940_s16 = sadd.s32 4294967295, %s890_s15   ;;  %s644_s17 = sadd.s32 4294967294, %s890_s15   ;;  %s890_s15 = sphi %s925_s15, %s1156_s15   ;;  %s886_s14 = sphi %s923_s14, %s1155_s14   ;;  %s882_s13 = sphi %s921_s13, %s1154_s13   ;;  %s878_s12 = sphi %s919_s12, %s1153_s12  }
   0x4   : > { %s944_s18 = sadd.s32 1, %s890_s15   ;;  %s91_s19 = sadd.s32 1, %s886_s14 }
   0x5   : > { %s88_s20 = ssub.s32 %s890_s15, %s944_s18  ;;  %p101_p0 = scmp.ne.s32.totalorder %s886_s14, %s882_s13 }
   0x6   : > { %p89_p1 = scmp.eq.s32.totalorder %s88_s20, 0  ;;  %p102_p2 = scmp.eq.s32.totalorder %s940_s16, 1 }
   0x7   : > { %p107_p3 = scmp.ne.s32.totalorder %s882_s13, %s878_s12  ;;  %p108_p4 = scmp.eq.s32.totalorder %s644_s17, 1 }
   0x8   : > { %s955_s21 = scalar_select %p89_p1, %s886_s14, %s91_s19  }
   0x9   : > { %p957_p5 = por %p102_p2, %p101_p0  ;;  %p961_p6 = por %p108_p4, %p107_p3 }
   0xa   : > { %p647_p7 = scmp.ge.s32.totalorder %s890_s15, 1  ;;  %p140_p8 = scmp.lt.s32.totalorder %s890_s15, 3 }
   0xc   : > { %p141_p9 = pnand %p647_p7, %p140_p8 }
   0xd   : > { %p164_p10 = scmp.lt.s32.totalorder (!%p141_p9), %s940_s16, 1  ;;  %s892_s29 = smov (!%p141_p9), 1  }
   0xe   : > { %144 = sbr.rel (%p141_p9) target bundleno = 346 (0x15a), region = 32  ;;  %s893_s30 = smov (!%p141_p9), 2  }
   0xf   : > { %s894_s4 = smov (!%p141_p9), 127   ;;  %s895_s5 = smov (!%p141_p9), 126  }
  0x10   : > { %s848_s11 = scalar_lea.hbm (!%p141_p9), %s1150_s3, 64 }
  0x13   : > { %s165_s24 = scalar_select %p164_p10, %s940_s16, 1  ;;  %vm175_vm0 = vcmask 130048   ;;  %vm215_vm1 = vcmask 392192   ;;  %v662_v15 = vld [vmem:[%s1148_s1 + $0x40] sm:$0xff]  ;;  %v663_v20 = vld [vmem:[%s1148_s1 + $0x48] sm:$0xff]  ;;  %v896_v23 = vmov 0  }
  0x14   : > { %v473_v22 = vld [vmem:[%s1149_s2 + $0x8] sm:$0xff]  ;;  %826 = vset.pattern.permute.xlu1 %v896_v23  ;;  %v472_v24 = vld [vmem:[%s1149_s2] sm:$0xff]  ;;  %825 = vset.pattern.permute.xlu0 %v896_v23  ;;  %v664_v31 = vld [vmem:[%s1148_s1 + $0x50] sm:$0xff] }
  0x15   : > { %s718_s25 = smul.u32 48, %s165_s24  ;;  %827 = vset.pattern.permute.xlu2 %v896_v23  ;;  %v475_v33 = vld [vmem:[%s1149_s2 + $0x18] sm:$0xff]  ;;  %v693_v36 = vld [vmem:[%s1149_s2 + $0x28] sm:$0xff]  ;;  %v652_v39 = vld [vmem:[%s1148_s1 + $0x30] sm:$0xff] }
  0x16   : > { %v650_v41 = vld [vmem:[%s1148_s1 + $0x20] sm:$0xff]  ;;  %v665_v47 = vld [vmem:[%s1148_s1 + $0x58] sm:$0xff]  ;;  %v694_v50 = vld [vmem:[%s1149_s2 + $0x30] sm:$0xff] }
  0x17   : > { %s168_s28 = scalar_lea.vmem %s1147_s0, %s718_s25  ;;  %v676_v51 = vld [vmem:[%s1148_s1 + $0x60] sm:$0xff]  ;;  %v653_v54 = vld [vmem:[%s1148_s1 + $0x38] sm:$0xff]  ;;  %v651_v60 = vld [vmem:[%s1148_s1 + $0x28] sm:$0xff]  ;;  %s161_s25 = sand.u32 1, %s882_s13  }
  0x18   : > { %v173_v0 = vld [vmem:[%s168_s28 + $0x20] sm:$0xff]  ;;  %v174_v1 = vld [vmem:[%s168_s28 + $0x28] sm:$0xff]  ;;  %v171_v9 = vld [vmem:[%s168_s28 + $0x10] sm:$0xff]  ;;  %s648_s26 = sshll.u32 %s161_s25, 5 }
  0x19   : > { %v169_v2 = vld [vmem:[%s168_s28] sm:$0xff]  ;;  %v180_v3 = vsel %vm175_vm0, %v173_v0, 0.0  ;;  %v181_v4 = vsel %vm175_vm0, %v174_v1, 0.0  ;;  %v170_v5 = vld [vmem:[%s168_s28 + $0x8] sm:$0xff]  ;;  %666 = vmatpush.msk.msra.mxu2 %vm175_vm0, %v174_v1  ;;  %v172_v10 = vld [vmem:[%s168_s28 + $0x18] sm:$0xff]  ;;  %v178_v12 = vsel %vm175_vm0, %v171_v9, 0.0 }
  0x1a   : > { %v176_v6 = vsel %vm175_vm0, %v169_v2, 0.0  ;;  %v765_v7 = vpack.i.bf16 %v180_v3, %v181_v4  ;;  %v177_v8 = vsel %vm175_vm0, %v170_v5, 0.0  ;;  %v179_v13 = vsel %vm175_vm0, %v172_v10, 0.0  ;;  %v696_v53 = vld [vmem:[%s1149_s2 + $0x40] sm:$0xff]  ;;  %v474_v63 = vld [vmem:[%s1149_s2 + $0x10] sm:$0xff]  ;;  %v699_v3 = vld [vmem:[%s1149_s2 + $0x58] sm:$0xff] }
  0x1b   : > { %v775_v11 = vpack.i.bf16 %v176_v6, %v177_v8  ;;  %667 = vmatpush.msk.msra.mxu2 %vm175_vm0, %v173_v0  ;;  %v770_v14 = vpack.i.bf16 %v178_v12, %v179_v13  ;;  %v194_v4 = vld [vmem:[%s1148_s1] sm:$0xff]  ;;  %v697_v6 = vld [vmem:[%s1149_s2 + $0x48] sm:$0xff]  ;;  %s1107_s27 = scalar_lea.vmem [#allocation2], %s648_s26  ;;  %s705_s28 = sshll.u32 %s940_s16, 5 }
  0x1c   : > { %766 = vrot.lane.b32.xlu0 %v765_v7, %s892_s29  ;;  %786 = vrot.lane.b32.xlu2 %v765_v7, %s893_s30  ;;  %v684_v8 = vld [vmem:[%s1148_s1 + $0x80] sm:$0xff]  ;;  %v195_v12 = vld [vmem:[%s1148_s1 + $0x8] sm:$0xff]  ;;  %s567_s16 = scalar_lea.sflag [#allocation3], %s161_s25 }
  0x1d   : > { %776 = vrot.lane.b32.xlu1 %v775_v11, %s892_s29  ;;  %668 = vmatpush.msk.msra.mxu2 %vm175_vm0, %v172_v10  ;;  %v692_v10 = vld [vmem:[%s1149_s2 + $0x20] sm:$0xff]  ;;  %v685_v13 = vld [vmem:[%s1148_s1 + $0x88] sm:$0xff] }
  0x1f   : > { %669 = vmatpush.msk.msra.mxu2 %vm175_vm0, %v171_v9  ;;  %v687_v9 = vld [vmem:[%s1148_s1 + $0x98] sm:$0xff] }
  0x21   : > { %670 = vmatpush.msk.msra.mxu2 %vm175_vm0, %v170_v5 }
  0x23   : > { %671 = vmatpush.msk.msra.mxu2 %vm175_vm0, %v169_v2  ;;  %v677_v2 = vld [vmem:[%s1148_s1 + $0x68] sm:$0xff] }
  0x24   : > { %771 = vrot.lane.b32.xlu0 %v770_v14, %s892_s29  ;;  %791 = vrot.lane.b32.xlu2 %v770_v14, %s894_s4 }
  0x25   : > { %781 = vrot.lane.b32.xlu1 %v765_v7, %s894_s4  ;;  %672 = vmatmul.msk.f32.vlgmr.msra.gmra.mxu2 %vm215_vm1, %v662_v15  ;;  %v679_v15 = vld [vmem:[%s1148_s1 + $0x78] sm:$0xff] }
  0x2c   : > { %796 = vrot.lane.b32.xlu0 %v770_v14, %s893_s30  ;;  %806 = vrot.lane.b32.xlu2 %v775_v11, %s893_s30 }
  0x2d   : > { %801 = vrot.lane.b32.xlu1 %v775_v11, %s894_s4  ;;  %673 = vmatmul.msk.f32.gmra.mxu2 %vm215_vm1, %v663_v20  ;;  %s578_s4 = scalar_lea.hbm %s1150_s3, %s705_s28 }
  0x2e   : > { %s581_s6 = sshll.u32 %s578_s4, 4  ;;  %s582_s6 = int_to_ptr.hbm [resolvable:$true] %s581_s6 }
  0x2f   : > { %s842_s7 = sshra.s32 %s582_s6, 4  ;;  %s843_s7 = int_to_ptr.hbm [resolvable:$true] %s842_s7 }
  0x30   : > { %s844_s8 = scalar_lea.hbm %s843_s7, 32  ;;  %p849_p0 = scmp.lt.s32.totalorder %s843_s7, %s1150_s3 }
  0x31   : > { %p845_p11 = scmp.ne.s32.totalorder %s843_s7, %s844_s8  ;;  %p850_p1 = scmp.lt.s32.totalorder %s848_s11, %s844_s8 }
  0x33   : > { %p846_p12 = pnand %p845_p11, %p957_p5  ;;  %p851_p2 = por %p850_p1, %p849_p0 }
  0x34   : > { %811 = vrot.lane.b32.xlu0 %v765_v7, %s895_s5  ;;  %821 = vrot.lane.b32.xlu2 %v775_v11, %s895_s5  ;;  %v678_v11 = vld [vmem:[%s1148_s1 + $0x70] sm:$0xff] }
  0x35   : > { %816 = vrot.lane.b32.xlu1 %v770_v14, %s895_s5  ;;  %674 = vmatmul.msk.f32.gmra.mxu2 %vm215_vm1, %v664_v31  ;;  %v695_v14 = vld [vmem:[%s1149_s2 + $0x38] sm:$0xff]  ;;  %s579_s5 = sshll.u32 %s1107_s27, 4  ;;  %p847_p13 = pneg %p846_p12  ;;  %s580_s5 = int_to_ptr.vmem [resolvable:$true] %s579_s5 }
  0x37   : > { %p852_p3 = pnand %p851_p2, %p847_p13 }
  0x3c   : > { %488 = vperm.xlu0 %825, %v472_v24   ;;  %498 = vperm.xlu2 %827, %v474_v63  }
  0x3d   : > { %493 = vperm.xlu1 %826, %v473_v22   ;;  %675 = vmatmul.msk.f32.gmra.mxu2 %vm215_vm1, %v665_v47 }
  0x44   : > { %521 = vperm.xlu0 %825, %v693_v36   ;;  %516 = vperm.xlu2 %827, %v692_v10  }
  0x45   : > { %503 = vperm.xlu1 %826, %v475_v33  }
  0x4c   : > { %540 = vperm.xlu0 %825, %v696_v53   ;;  %531 = vperm.xlu2 %827, %v695_v14  }
  0x4d   : > { %526 = vperm.xlu1 %826, %v694_v50  }
  0x54   : > { %555 = vperm.xlu0 %825, %v699_v3  }
  0x55   : > { %545 = vperm.xlu1 %826, %v697_v6  }
  0x76   : > { %v988_v16 = vpop.permute.xlu2 %786 }
  0x77   : > { %v788_v42 = vunpack.i.l.bf16 %v988_v16  ;;  %v789_v48 = vunpack.i.h.bf16 %v988_v16  ;;  %v196_v16 = vld [vmem:[%s1148_s1 + $0x10] sm:$0xff] }
  0x7e   : > { %v792_v26 = vpop.permute.xlu2 %791 }
  0x7f   : > { %v793_v34 = vunpack.i.l.bf16 %v792_v26  ;;  %v794_v37 = vunpack.i.h.bf16 %v792_v26 }
  0x86   : > { %v807_v44 = vpop.permute.xlu2 %806 }
  0x87   : > { %v808_v56 = vunpack.i.l.bf16 %v807_v44  ;;  %v809_v61 = vunpack.i.h.bf16 %v807_v44 }
  0x8e   : > { %v767_v17 = vpop.permute.xlu0 %766  ;;  %v822_v0 = vpop.permute.xlu2 %821 }
  0x8f   : > { %v768_v18 = vunpack.i.l.bf16 %v767_v17  ;;  %v777_v19 = vpop.permute.xlu1 %776  ;;  %v769_v21 = vunpack.i.h.bf16 %v767_v17  ;;  %v823_v5 = vunpack.i.l.bf16 %v822_v0  ;;  %v824_v7 = vunpack.i.h.bf16 %v822_v0  ;;  %v686_v17 = vld [vmem:[%s1148_s1 + $0x90] sm:$0xff] }
  0x90   : > { %v778_v35 = vunpack.i.l.bf16 %v777_v19  ;;  %v779_v38 = vunpack.i.h.bf16 %v777_v19  ;;  %v197_v19 = vld [vmem:[%s1148_s1 + $0x18] sm:$0xff] }
  0x91   : > { %238 = vmatpush.msra.mxu0 %v768_v18  ;;  %706 = vmatpush.msra.mxu1 %v768_v18  ;;  %v698_v18 = vld [vmem:[%s1149_s2 + $0x50] sm:$0xff] }
  0x92   : > { %550 = vperm.xlu2 %827, %v698_v18  }
  0x93   : > { %239 = vmatpush.msra.mxu0 %v769_v21  ;;  %707 = vmatpush.msra.mxu1 %v769_v21 }
  0x96   : > { %v772_v25 = vpop.permute.xlu0 %771 }
  0x97   : > { %v773_v27 = vunpack.i.l.bf16 %v772_v25  ;;  %v782_v28 = vpop.permute.xlu1 %781  ;;  %v774_v32 = vunpack.i.h.bf16 %v772_v25 }
  0x98   : > { %v783_v29 = vunpack.i.l.bf16 %v782_v28  ;;  %v784_v30 = vunpack.i.h.bf16 %v782_v28 }
  0x99   : > { %240 = vmatpush.msra.mxu0 %v773_v27  ;;  %708 = vmatpush.msra.mxu1 %v773_v27 }
  0x9a   : > { %387 = vmatpush.msra.mxu3 %v783_v29  ;;  %v499_v29 = vpop.permute.xlu2 %498 }
  0x9b   : > { %241 = vmatpush.msra.mxu0 %v774_v32  ;;  %709 = vmatpush.msra.mxu1 %v774_v32 }
  0x9c   : > { %388 = vmatpush.msra.mxu3 %v784_v30 }
  0x9d   : > { %242 = vmatpush.msra.mxu0 %v778_v35  ;;  %710 = vmatpush.msra.mxu1 %v778_v35 }
  0x9e   : > { %v797_v40 = vpop.permute.xlu0 %796  ;;  %389 = vmatpush.msra.mxu3 %v793_v34 }
  0x9f   : > { %243 = vmatpush.msra.mxu0 %v779_v38  ;;  %711 = vmatpush.msra.mxu1 %v779_v38  ;;  %v802_v43 = vpop.permute.xlu1 %801  ;;  %v798_v49 = vunpack.i.l.bf16 %v797_v40  ;;  %v799_v52 = vunpack.i.h.bf16 %v797_v40 }
  0xa0   : > { %656 = vmatmul.msk.f32.vlgmr.msra.gmra.mxu1 %vm215_vm1, %v652_v39  ;;  %390 = vmatpush.msra.mxu3 %v794_v37  ;;  %v803_v45 = vunpack.i.l.bf16 %v802_v43  ;;  %v804_v46 = vunpack.i.h.bf16 %v802_v43 }
  0xa1   : > { %279 = vmatpush.msrb.mxu1 %v788_v42  ;;  %654 = vmatmul.msk.f32.vlgmr.msra.gmra.mxu0 %vm215_vm1, %v650_v41 }
  0xa2   : > { %391 = vmatpush.msra.mxu3 %v803_v45  ;;  %v517_v43 = vpop.permute.xlu2 %516 }
  0xa3   : > { %280 = vmatpush.msrb.mxu1 %v789_v48 }
  0xa4   : > { %392 = vmatpush.msra.mxu3 %v804_v46 }
  0xa5   : > { %281 = vmatpush.msrb.mxu1 %v798_v49  ;;  %680 = vmatmul.msk.f32.vlgmr.msra.gmra.mxu3 %vm215_vm1, %v676_v51 }
  0xa6   : > { %v812_v55 = vpop.permute.xlu0 %811 }
  0xa7   : > { %282 = vmatpush.msrb.mxu1 %v799_v52  ;;  %v813_v57 = vunpack.i.l.bf16 %v812_v55  ;;  %v814_v58 = vunpack.i.h.bf16 %v812_v55  ;;  %v817_v59 = vpop.permute.xlu1 %816 }
  0xa8   : > { %657 = vmatmul.msk.f32.gmra.mxu1 %vm215_vm1, %v653_v54  ;;  %v818_v62 = vunpack.i.l.bf16 %v817_v59  ;;  %v819_v1 = vunpack.i.h.bf16 %v817_v59  ;;  %v332_v22 = vpop.f32.mrf.mxu2 }
  0xa9   : > { %449 = vmatpush.msrb.mxu0 %v813_v57  ;;  %712 = vmatpush.msrb.mxu2 %v813_v57 }
  0xaa   : > { %283 = vmatpush.msrb.mxu1 %v808_v56  ;;  %655 = vmatmul.msk.f32.gmra.mxu0 %vm215_vm1, %v651_v60  ;;  %v532_v60 = vpop.permute.xlu2 %531 }
  0xab   : > { %450 = vmatpush.msrb.mxu0 %v814_v58  ;;  %713 = vmatpush.msrb.mxu2 %v814_v58 }
  0xac   : > { %284 = vmatpush.msrb.mxu1 %v809_v61 }
  0xad   : > { %451 = vmatpush.msrb.mxu0 %v818_v62  ;;  %714 = vmatpush.msrb.mxu2 %v818_v62 }
  0xae   : > { %681 = vmatmul.msk.f32.gmra.mxu3 %vm215_vm1, %v677_v2  ;;  %v489_v25 = vpop.permute.xlu0 %488 }
  0xaf   : > { %452 = vmatpush.msrb.mxu0 %v819_v1  ;;  %715 = vmatpush.msrb.mxu2 %v819_v1  ;;  %v494_v23 = vpop.permute.xlu1 %493 }
  0xb0   : > { %658 = vmatmul.msk.f32.vlgmr.msrb.gmra.mxu1 %vm215_vm1, %v194_v4  ;;  %v335_v28 = vpop.f32.mrf.mxu2 }
  0xb1   : > { %453 = vmatpush.msrb.mxu0 %v823_v5  ;;  %716 = vmatpush.msrb.mxu2 %v823_v5 }
  0xb3   : > { %454 = vmatpush.msrb.mxu0 %v824_v7  ;;  %717 = vmatpush.msrb.mxu2 %v824_v7 }
  0xb4   : > { %688 = vmatmul.msk.f32.vlgmr.msrb.gmra.mxu0 %vm215_vm1, %v684_v8  ;;  %691 = vmatmul.msk.f32.vlgmr.msrb.gmra.mxu2 %vm215_vm1, %v687_v9 }
  0xb6   : > { %682 = vmatmul.msk.f32.gmra.mxu3 %vm215_vm1, %v678_v11  ;;  %v522_v34 = vpop.permute.xlu0 %521 }
  0xb7   : > { %v504_v32 = vpop.permute.xlu1 %503 }
  0xb8   : > { %659 = vmatmul.msk.f32.gmra.mxu1 %vm215_vm1, %v195_v12  ;;  %v338_v40 = vpop.f32.mrf.mxu2 }
  0xbc   : > { %689 = vmatmul.msk.f32.gmra.mxu0 %vm215_vm1, %v685_v13 }
  0xbe   : > { %683 = vmatmul.msk.f32.gmra.mxu3 %vm215_vm1, %v679_v15  ;;  %v541_v50 = vpop.permute.xlu0 %540 }
  0xbf   : > { %v527_v46 = vpop.permute.xlu1 %526 }
  0xc0   : > { %660 = vmatmul.msk.f32.gmra.mxu1 %vm215_vm1, %v196_v16  ;;  %v341_v57 = vpop.f32.mrf.mxu2 }
  0xc4   : > { %690 = vmatmul.msk.f32.gmra.mxu0 %vm215_vm1, %v686_v17 }
  0xc6   : > { %v556_v18 = vpop.permute.xlu0 %555 }
  0xc7   : > { %v546_v0 = vpop.permute.xlu1 %545 }
  0xc8   : > { %661 = vmatmul.msk.f32.gmra.mxu1 %vm215_vm1, %v197_v19 }
  0xec   : > { %v551_v12 = vpop.permute.xlu2 %550 }
 0x11d   : > { %v251_v20 = vpop.f32.mrf.mxu1 }
 0x11e   : > { %v245_v21 = vpop.f32.mrf.mxu0 }
 0x125   : > { %v254_v24 = vpop.f32.mrf.mxu1 }
 0x127   : > { %v248_v26 = vpop.f32.mrf.mxu0 }
 0x128   : > { %v394_v27 = vpop.f32.mrf.mxu3 }
 0x12d   : > { %v286_v30 = vpop.f32.mrf.mxu1 }
 0x12e   : > { %v287_v31 = vadd.f32 %v286_v30, %v245_v21 }
 0x130   : > { %v344_v33 = vadd.f32 %v332_v22, %v287_v31 }
 0x131   : > { %v456_v35 = vpop.f32.mrf.mxu0  ;;  %v397_v37 = vpop.f32.mrf.mxu3 }
 0x132   : > { %v406_v36 = vadd.f32 %v394_v27, %v344_v33 }
 0x134   : > { %v468_v38 = vadd.f32 %v456_v35, %v406_v36 }
 0x135   : > { %v289_v39 = vpop.f32.mrf.mxu1 }
 0x136   : > { %v506_v41 = vadd.f32 %v489_v25, %v468_v38  ;;  %v290_v42 = vadd.f32 %v289_v39, %v248_v26 }
 0x137   : > { %v465_v9 = vpop.f32.mrf.mxu2 }
 0x138   : > { %v510_v44 = vmax.f32 %v506_v41, 0.0  ;;  %v345_v45 = vadd.f32 %v335_v28, %v290_v42 }
 0x139   : > { %v459_v47 = vpop.f32.mrf.mxu0  ;;  %v400_v54 = vpop.f32.mrf.mxu3 }
 0x13a   : > { %v534_v48 = vmul.f32 %v517_v43, %v510_v44  ;;  %v407_v49 = vadd.f32 %v397_v37, %v345_v45 }
 0x13c   : > { %v558_v51 = vadd.f32 %v541_v50, %v534_v48  ;;  %v469_v52 = vadd.f32 %v459_v47, %v407_v49 }
 0x13d   : > { %v292_v53 = vpop.f32.mrf.mxu1 }
 0x13e   : > { %562 = vst [vmem:[%s1107_s27] sm:$0xff] %v558_v51  ;;  %v507_v55 = vadd.f32 %v494_v23, %v469_v52  ;;  %v293_v56 = vadd.f32 %v292_v53, %v251_v20 }
 0x140   : > { %v511_v58 = vmax.f32 %v507_v55, 0.0  ;;  %v346_v59 = vadd.f32 %v338_v40, %v293_v56 }
 0x141   : > { %v462_v61 = vpop.f32.mrf.mxu0  ;;  %v403_v6 = vpop.f32.mrf.mxu3 }
 0x142   : > { %v535_v62 = vmul.f32 %v522_v34, %v511_v58  ;;  %v408_v63 = vadd.f32 %v400_v54, %v346_v59 }
 0x144   : > { %v559_v1 = vadd.f32 %v546_v0, %v535_v62  ;;  %v470_v2 = vadd.f32 %v462_v61, %v408_v63 }
 0x145   : > { %v295_v3 = vpop.f32.mrf.mxu1 }
 0x146   : > { %563 = vst [vmem:[%s1107_s27 + $0x8] sm:$0xff] %v559_v1  ;;  %v508_v4 = vadd.f32 %v499_v29, %v470_v2  ;;  %v296_v5 = vadd.f32 %v295_v3, %v254_v24 }
 0x148   : > { %v512_v7 = vmax.f32 %v508_v4, 0.0  ;;  %v347_v8 = vadd.f32 %v341_v57, %v296_v5 }
 0x14a   : > { %v536_v10 = vmul.f32 %v527_v46, %v512_v7  ;;  %v409_v11 = vadd.f32 %v403_v6, %v347_v8 }
 0x14c   : > { %v560_v13 = vadd.f32 %v551_v12, %v536_v10  ;;  %v471_v14 = vadd.f32 %v465_v9, %v409_v11 }
 0x14e   : > { %564 = vst [vmem:[%s1107_s27 + $0x10] sm:$0xff] %v560_v13  ;;  %v509_v15 = vadd.f32 %v504_v32, %v471_v14 }
 0x150   : > { %v513_v16 = vmax.f32 %v509_v15, 0.0 }
 0x152   : > { %v537_v17 = vmul.f32 %v532_v60, %v513_v16 }
 0x154   : > { %v561_v19 = vadd.f32 %v556_v18, %v537_v17 }
 0x156   : > { %565 = vst [vmem:[%s1107_s27 + $0x18] sm:$0xff] %v561_v19 }
 0x157   : > { %855 = shalt.err (!%p852_p3)
}
 0x158   : > { %s897_s20 = smov 128   ;;  %s898_s24 = smov 8  }
 0x159   : > { %719 = dma.vmem_to_hbm [thread:$0]  (%p957_p5), %s580_s5, 512, %s582_s6, %s567_s16, %s897_s20, %s897_s20, %s898_s24  }
 0x15a PF: > { %p725_p4 = scmp.ge.s32.totalorder %s890_s15, 2  ;;  %s596_s25 = sand.u32 1, %s878_s12  }
 0x15b   : > { %s597_s26 = scalar_lea.sflag [#allocation3], %s596_s25 }
 0x15c   : > { %p722_p7 = pnand %p725_p4, %p961_p6 }
 0x15e   : > { %p723_p8 = pneg %p722_p7 }
 0x160   : > { %873 = dma.done.wait (%p723_p8), %s597_s26, 512  }
 0x161   : > { %875 = vsyncadd (%p723_p8), %s597_s26, 4294966784  ;;  %p13_p9 = scmp.ge.s32.totalorder %s944_s18, 4   ;;  %s1153_s12 = smov %s882_s13 }
 0x162   : > { %s1154_s13 = smov %s886_s14  ;;  %s1155_s14 = smov %s955_s21 }
 0x163   : > { %s1156_s15 = smov %s944_s18  ;;  %15 = sbr.rel (!%p13_p9) target bundleno = 3 (0x3), region = 73 }
 0x168   :  { %603 = vsyncpa [#allocation3], 1 }
 0x169   :  { %605 = vsyncpa [#allocation3 + $0x1], 1 }

</bundles_post_ra>
